<compile_context>
chip_gen: v6e
topology: v6e:2x2x1
jax: 0.10.0
libtpu: 0.0.40
codegen_flags: <defaults>
</compile_context>

<pallas_src>
import functools

import jax
import jax.numpy as jnp
from jax.experimental import pallas as pl
from jax.experimental.pallas import tpu as pltpu

_TEMP_BYTES = 16  # per-element f32 temporary headroom (upcast lp, weights, ids, product)


def _label_smoothing_kernel(logprobs_ref, target_ref, loss_ref, *,
                            confidence, smoothing, n_rows, n_cols, mask_cols):
    i = pl.program_id(0)              # row-tile index     ("parallel")
    j = pl.program_id(1)              # class-chunk index  ("arbitrary", innermost)

    @pl.when(j == 0)
    def _():
        loss_ref[...] = jnp.zeros_like(loss_ref)

    lp = logprobs_ref[...].astype(jnp.float32)     # (tile_n, tile_c), in-kernel upcast
    tgt = target_ref[...]                          # (tile_n, 1) int32
    tn, tc = lp.shape

    # Absolute class ids for this chunk.
    cls_ids = j * tc + jax.lax.broadcasted_iota(jnp.int32, (tn, tc), 1)
    if mask_cols:
        # Padded lane columns of a ragged last chunk hold garbage (possibly NaN):
        # discard with a select, never a multiplicative mask.
        lp = jnp.where(cls_ids < n_cols, lp, 0.0)

    # Fused per-class weights:
    #   loss_row = confidence * (-lp[target]) + smoothing * (-mean(lp))
    #            = -sum(lp * (confidence * onehot + smoothing / C))
    uniform_w = smoothing / n_cols
    w = jnp.where(cls_ids == tgt, confidence + uniform_w, uniform_w)
    loss_ref[...] += -jnp.sum(lp * w, axis=-1, keepdims=True)      # (tile_n, 1)

    @pl.when(j == pl.num_programs(1) - 1)
    def _():
        # Ragged-tail rows of the last row tile are undefined: select them to 0 so the
        # wrapper-side sum / n_rows is exact (select after the lane reduce, NaN-safe).
        row_ids = i * tn + jax.lax.broadcasted_iota(jnp.int32, (tn, 1), 0)
        loss_ref[...] = jnp.where(row_ids < n_rows, loss_ref[...], 0.0)


def label_smoothing_loss(logprobs, target, smoothing=0.0, tile_n=None, tile_c=None):
    """Pallas equivalent of LabelSmoothingLoss(smoothing)(logprobs, target)."""
    n, c = logprobs.shape
    confidence = 1.0 - smoothing
    target2d = target.astype(jnp.int32).reshape(n, 1)
    itemsize = jnp.dtype(logprobs.dtype).itemsize

    # Generation-aware VMEM budget (~1/3 of physical: ~42 MiB v5e/v6e, ~21 MiB v7x).
    vmem_cap = 64 << 20                                    # v7x-safe fallback
    try:
        vmem_cap = int(pltpu.get_tpu_info().vmem_capacity_bytes)
    except Exception:
        pass
    budget = max(8 << 20, vmem_cap // 3)

    # Per-row working footprint per class column: double-buffered input bytes plus the
    # f32 temporaries of the elementwise chain (sized from f32 even for bf16 inputs).
    per_col_bytes = 2 * itemsize + _TEMP_BYTES

    # Class chunking only when even an 8-row full-C tile would overflow the budget
    # (vocab-scale C against v7x's 64 MiB VMEM).
    if tile_c is None:
        if 8 * c * per_col_bytes <= budget:
            tile_c = c
        else:
            tile_c = max(128, (budget // (8 * per_col_bytes)) // 128 * 128)
    if tile_c >= c:
        tile_c = c
    else:
        tile_c = min(c, max(128, (int(tile_c) // 128) * 128))  # lane-aligned chunks

    n_pad8 = ((n + 7) // 8) * 8
    if tile_n is None:
        # No small row cap: aim for multi-MiB per-step DMA (>=1-2 MiB amortizes the
        # ~0.35us per-grid-step cost), bounded by the VMEM budget; a ~16 MiB cap keeps
        # the pipeline granular.
        rows_vmem = budget // max(tile_c * per_col_bytes + 16, 1)
        rows_dma = (16 << 20) // max(tile_c * itemsize, 1)
        tile_n = min(rows_vmem, max(rows_dma, 8))
    tile_n = max(8, min(int(tile_n), n_pad8))
    tile_n = (tile_n // 8) * 8

    g_rows = pl.cdiv(n, tile_n)
    g_c = pl.cdiv(c, tile_c)
    mask_cols = (c % tile_c) != 0

    lp_tile_bytes = tile_n * tile_c * itemsize
    work_bytes = (2 * lp_tile_bytes                    # double-buffered logprobs tile
                  + tile_n * tile_c * _TEMP_BYTES      # f32 temporaries
                  + 4 * tile_n * 128 * 4)              # target + per-row-loss blocks (lane-padded)
    vmem_bytes = int(min(vmem_cap * 7 // 8, max(32 << 20, work_bytes + (4 << 20))))

    kernel = functools.partial(
        _label_smoothing_kernel,
        confidence=confidence, smoothing=smoothing,
        n_rows=n, n_cols=c, mask_cols=mask_cols)

    per_row = pl.pallas_call(
        kernel,
        out_shape=jax.ShapeDtypeStruct((g_rows * tile_n, 1), jnp.float32),
        grid=(g_rows, g_c),
        in_specs=[
            pl.BlockSpec((tile_n, tile_c), lambda i, j: (i, j)),   # streamed logprob tile
            pl.BlockSpec((tile_n, 1), lambda i, j: (i, 0)),        # matching target rows
        ],
        out_specs=pl.BlockSpec((tile_n, 1), lambda i, j: (i, 0)),  # per-row losses
        compiler_params=pltpu.CompilerParams(
            dimension_semantics=("parallel", "arbitrary"),
            vmem_limit_bytes=vmem_bytes),
    )(logprobs, target2d)

    # Tiny cross-tile reduction in plain JAX: keeps the row axis parallel across both
    # v7x TensorCores and avoids a long sequential scalar accumulation.
    return jnp.sum(per_row) / n


if __name__ == "__main__":
    key = jax.random.PRNGKey(0)
    k1, k2 = jax.random.split(key)

    N, C = 20, 256            # ragged N (not a multiple of the row tile) on purpose
    smoothing = 0.1

    logits = jax.random.normal(k1, (N, C), dtype=jnp.float32)
    logprobs = jax.nn.log_softmax(logits, axis=-1)
    target = jax.random.randint(k2, (N,), 0, C, dtype=jnp.int32)

    # Pure-JAX reference (mirrors the PyTorch forward exactly).
    ref_nll = -jnp.take_along_axis(logprobs, target[:, None], axis=-1)[:, 0]
    ref_smooth = -jnp.mean(logprobs, axis=-1)
    ref = jnp.mean((1.0 - smoothing) * ref_nll + smoothing * ref_smooth)

    # 1) Forced small row tile + class chunking: grid (3, 2), exercises ragged-row
    #    masking and cross-chunk accumulation in the VMEM output block.
    loss_a = jax.block_until_ready(
        label_smoothing_loss(logprobs, target, smoothing=smoothing, tile_n=8, tile_c=128))
    assert jnp.allclose(loss_a, ref, atol=1e-5, rtol=1e-5), (loss_a, ref)

    # 2) Auto tiling: single large tile, grid (1, 1).
    loss_b = jax.block_until_ready(
        label_smoothing_loss(logprobs, target, smoothing=smoothing))
    assert jnp.allclose(loss_b, ref, atol=1e-5, rtol=1e-5), (loss_b, ref)

    # 3) bf16 path: no wrapper-side cast; kernel upcasts the loaded tile.
    lp_bf16 = logprobs.astype(jnp.bfloat16)
    lp_rt = lp_bf16.astype(jnp.float32)
    ref_bf16 = jnp.mean(
        (1.0 - smoothing) * (-jnp.take_along_axis(lp_rt, target[:, None], axis=-1)[:, 0])
        + smoothing * (-jnp.mean(lp_rt, axis=-1)))
    loss_c = jax.block_until_ready(
        label_smoothing_loss(lp_bf16, target, smoothing=smoothing, tile_n=8))
    assert jnp.allclose(loss_c, ref_bf16, atol=1e-4, rtol=1e-4), (loss_c, ref_bf16)

    print("KERNEL_OK")
</pallas_src>

<mosaic_0001>
module attributes {stable_mosaic.version = 11 : i64} {
  func.func @_label_smoothing_kernel(%arg0: i32, %arg1: i32, %arg2: memref<8x128xf32, #tpu.memory_space<vmem>>, %arg3: memref<8x1xi32, #tpu.memory_space<vmem>>, %arg4: memref<8x1xf32, #tpu.memory_space<vmem>>) attributes {dimension_semantics = [#tpu.dimension_semantics<parallel>, #tpu.dimension_semantics<arbitrary>], iteration_bounds = array<i64: 3, 2>, scalar_prefetch = 0 : i64, scratch_operands = 0 : i64, tpu.core_type = #tpu.core_type<tc>, window_params = [{transform_indices = @transform_0, window_bounds = array<i64: 8, 128>}, {transform_indices = @transform_1, window_bounds = array<i64: 8, 1>}, {transform_indices = @transform_2, window_bounds = array<i64: 8, 1>}]} {
    %c0_i32 = arith.constant 0 : i32
    %0 = arith.cmpi eq, %arg1, %c0_i32 : i32
    %1 = arith.extui %0 : i1 to i32
    %c0_i32_0 = arith.constant 0 : i32
    %2 = arith.cmpi ne, %1, %c0_i32_0 : i32
    scf.if %2 {
      %cst_12 = arith.constant 0.000000e+00 : f32
      %25 = vector.broadcast %cst_12 : f32 to vector<8x1xf32>
      %c0_13 = arith.constant 0 : index
      %c0_14 = arith.constant 0 : index
      %26 = vector.load %arg4[%c0_13, %c0_14] : memref<8x1xf32, #tpu.memory_space<vmem>>, vector<8x1xf32>
      tpu.vector_store %arg4[%c0_13, %c0_14], %25 {strides = array<i32>} : memref<8x1xf32, #tpu.memory_space<vmem>>, vector<8x1xf32>,
    } else {
    }
    %c0 = arith.constant 0 : index
    %c0_1 = arith.constant 0 : index
    %3 = vector.load %arg2[%c0, %c0_1] : memref<8x128xf32, #tpu.memory_space<vmem>>, vector<8x128xf32>
    %c0_2 = arith.constant 0 : index
    %c0_3 = arith.constant 0 : index
    %4 = vector.load %arg3[%c0_2, %c0_3] : memref<8x1xi32, #tpu.memory_space<vmem>>, vector<8x1xi32>
    %c128_i32 = arith.constant 128 : i32
    %5 = arith.muli %arg1, %c128_i32 : i32
    %6 = tpu.iota {dimensions = array<i32: 1>} : vector<8x128xi32>
    %7 = vector.broadcast %5 : i32 to vector<8x128xi32>
    %8 = arith.addi %7, %6 : vector<8x128xi32>
    %9 = vector.broadcast %4 : vector<8x1xi32> to vector<8x128xi32>
    %10 = arith.cmpi eq, %8, %9 : vector<8x128xi32>
    %cst = arith.constant 0.900390625 : f32
    %cst_4 = arith.constant 3.906250e-04 : f32
    %11 = vector.broadcast %cst : f32 to vector<8x128xf32>
    %12 = vector.broadcast %cst_4 : f32 to vector<8x128xf32>
    %13 = arith.select %10, %11, %12 : vector<8x128xi1>, vector<8x128xf32>
    %c0_5 = arith.constant 0 : index
    %c0_6 = arith.constant 0 : index
    %14 = vector.load %arg4[%c0_5, %c0_6] : memref<8x1xf32, #tpu.memory_space<vmem>>, vector<8x1xf32>
    %15 = arith.mulf %3, %13 : vector<8x128xf32>
    %cst_7 = arith.constant dense<0.000000e+00> : vector<8xf32>
    %16 = vector.multi_reduction <add>, %15, %cst_7 [1] : vector<8x128xf32> to vector<8xf32>
    %17 = vector.shape_cast %16 : vector<8xf32> to vector<8x1xf32>
    %cst_8 = arith.constant 0.000000e+00 : f32
    %18 = vector.broadcast %cst_8 : f32 to vector<8x1xf32>
    %19 = arith.subf %18, %17 : vector<8x1xf32>
    %20 = arith.addf %14, %19 : vector<8x1xf32>
    %c0_9 = arith.constant 0 : index
    %c0_10 = arith.constant 0 : index
    %21 = vector.load %arg4[%c0_9, %c0_10] : memref<8x1xf32, #tpu.memory_space<vmem>>, vector<8x1xf32>
    tpu.vector_store %arg4[%c0_9, %c0_10], %20 {strides = array<i32>} : memref<8x1xf32, #tpu.memory_space<vmem>>, vector<8x1xf32>,
    %c1_i32 = arith.constant 1 : i32
    %22 = arith.cmpi eq, %arg1, %c1_i32 : i32
    %23 = arith.extui %22 : i1 to i32
    %c0_i32_11 = arith.constant 0 : i32
    %24 = arith.cmpi ne, %23, %c0_i32_11 : i32
    scf.if %24 {
      %c8_i32 = arith.constant 8 : i32
      %25 = arith.muli %arg0, %c8_i32 : i32
      %26 = tpu.iota {dimensions = array<i32: 0>} : vector<8x1xi32>
      %27 = vector.broadcast %25 : i32 to vector<8x1xi32>
      %28 = arith.addi %27, %26 : vector<8x1xi32>
      %c20_i32 = arith.constant 20 : i32
      %29 = vector.broadcast %c20_i32 : i32 to vector<8x1xi32>
      %30 = arith.cmpi slt, %28, %29 : vector<8x1xi32>
      %c0_12 = arith.constant 0 : index
      %c0_13 = arith.constant 0 : index
      %31 = vector.load %arg4[%c0_12, %c0_13] : memref<8x1xf32, #tpu.memory_space<vmem>>, vector<8x1xf32>
      %cst_14 = arith.constant 0.000000e+00 : f32
      %32 = vector.broadcast %cst_14 : f32 to vector<8x1xf32>
      %33 = arith.select %30, %31, %32 : vector<8x1xi1>, vector<8x1xf32>
      %c0_15 = arith.constant 0 : index
      %c0_16 = arith.constant 0 : index
      %34 = vector.load %arg4[%c0_15, %c0_16] : memref<8x1xf32, #tpu.memory_space<vmem>>, vector<8x1xf32>
      tpu.vector_store %arg4[%c0_15, %c0_16], %33 {strides = array<i32>} : memref<8x1xf32, #tpu.memory_space<vmem>>, vector<8x1xf32>,
    } else {
    }
    return
  }
  func.func @transform_0(%arg0: i32, %arg1: i32) -> (i32, i32) {
    %c0_i32 = arith.constant 0 : i32
    return %arg0, %arg1 : i32, i32
  }
  func.func @transform_1(%arg0: i32, %arg1: i32) -> (i32, i32) {
    %c0_i32 = arith.constant 0 : i32
    %c0_i32_0 = arith.constant 0 : i32
    return %arg0, %c0_i32 : i32, i32
  }
  func.func @transform_2(%arg0: i32, %arg1: i32) -> (i32, i32) {
    %c0_i32 = arith.constant 0 : i32
    %c0_i32_0 = arith.constant 0 : i32
    return %arg0, %c0_i32 : i32, i32
  }
}

</mosaic_0001>

<bundles_post_ra>
// kernel: tpu_custom_call.1
= control target key start
LH: loop header
LB: loop body
LE: loop exit
PB: predicated region body
PF: predicated region fallthrough
CT: control target
= control target key end

     0   :  { %7 = vsyncpa [#allocation3], 0  ;;  %s667_s0 = inlined_call_operand.hbm [shape: f32[20,256], index: 0, kind: input, shape index: {}]   ;;  %s668_s1 = inlined_call_operand.vmem [shape: s32[20,1], index: 1, kind: input, shape index: {}]   ;;  %s669_s2 = inlined_call_operand.vmem [shape: f32[24,1], index: 2, kind: output, shape index: {}]  }
   0x1   :  { %9 = vsyncpa [#allocation3 + $0x1], 0  ;;  %s528_s9 = smov 0   ;;  %s530_s10 = smov 0  }
   0x2   :  { %s532_s11 = smov 0   ;;  %s534_s12 = smov 0  }
   0x3   :  { %s536_s13 = smov 0   ;;  %s538_s14 = smov 0  }
   0x4   :  { %s540_s15 = smov 0   ;;  %s542_s16 = smov 0  }
   0x5 LB: > { %s321_s17 = sadd.s32 4294967295, %s507_s16   ;;  %s24_s18 = sadd.s32 1, %s499_s14  ;;  %s507_s16 = sphi %s542_s16, %s15_s16   ;;  %s503_s15 = sphi %s540_s15, %s679_s15   ;;  %s499_s14 = sphi %s538_s14, %s678_s14   ;;  %s495_s13 = sphi %s536_s13, %s677_s13   ;;  %s491_s12 = sphi %s534_s12, %s676_s12   ;;  %s487_s11 = sphi %s532_s11, %s675_s11   ;;  %s483_s10 = sphi %s530_s10, %s674_s10   ;;  %s479_s9 = sphi %s528_s9, %s673_s9  }
   0x6   : > { %p25_p0 = scmp.ge.s32.totalorder %s24_s18, 2  ;;  %s27_s19 = sadd.s32 1, %s503_s15 }
   0x7   : > { %s36_s20 = sadd.s32 1, %s487_s11  ;;  %p43_p1 = scmp.ne.s32.totalorder %s487_s11, %s483_s10 }
   0x8   : > { %s681_s18 = smov (%p25_p0, %s24_s18), 0  ;;  %s683_s19 = smov (!%p25_p0, %s27_s19), %s503_s15 }
   0x9   : > { %s32_s21 = ssub.s32 %s499_s14, %s681_s18  ;;  %p44_p2 = scmp.eq.s32.totalorder %s507_s16, 0 }
   0xa   : > { %p29_p3 = scmp.ge.s32.totalorder %s683_s19, 3  ;;  %p49_p4 = scmp.ne.s32.totalorder %s483_s10, %s479_s9 }
   0xb   : > { %p579_p5 = por %p44_p2, %p43_p1  ;;  %p50_p6 = scmp.eq.s32.totalorder %s321_s17, 0 }
   0xc   : > { %s685_s19 = smov (%p29_p3, %s683_s19), 0  ;;  %p344_p8 = scmp.lt.s32.totalorder %s507_s16, 6 }
   0xd   : > { %p585_p7 = por %p50_p6, %p49_p4  ;;  %s31_s24 = ssub.s32 %s503_s15, %s685_s19 }
   0xe   : > { %s33_s25 = sor.u32 %s32_s21, %s31_s24  ;;  %s125_s26 = sand.u32 1, %s487_s11  }
   0xf   : > { %p34_p9 = scmp.eq.s32.totalorder %s33_s25, 0  ;;  %s325_s27 = sshll.u32 %s125_s26, 3 }
  0x10   : > { %s326_s28 = sshll.u32 %s503_s15, 1  ;;  %s129_s4 = scalar_lea.vmem [#allocation2], %s325_s27 }
  0x11   : > { %s595_s29 = scalar_select %p34_p9, %s487_s11, %s36_s20  }
  0x12   : > { %s134_s30 = sadd.s32 %s499_s14, %s326_s28  ;;  %s138_s5 = sshll.u32 %s129_s4, 4  ;;  %s139_s5 = int_to_ptr.vmem [resolvable:$true] %s138_s5 }
  0x13   : > { %s327_s3 = sshll.u32 %s134_s30, 7  ;;  %p605_p10 = pnand %p344_p8, %p579_p5 }
  0x14   : > { %s136_s8 = scalar_lea.hbm %s667_s0, %s327_s3  ;;  %p328_p11 = scmp.ge.s32.totalorder %s507_s16, 1 }
  0x15   : > { %p150_p12 = scmp.lt.s32.totalorder %s507_s16, 7  ;;  %s126_s17 = scalar_lea.sflag [#allocation3], %s125_s26 }
  0x16   : > { %p415_p13 = pneg %p605_p10  ;;  %s426_s20 = scalar_lea.vmem %s139_s5, 128 }
  0x17   : > { %p427_p0 = scmp.ne.s32.totalorder %s139_s5, %s426_s20  ;;  %s509_s21 = smov [#allocation2]  }
  0x18   : > { %s431_s24 = sshll.u32 %s509_s21, 4  ;;  %s432_s24 = int_to_ptr.vmem [resolvable:$false] %s431_s24 }
  0x19   : > { %p429_p1 = pnand %p427_p0, %p415_p13  ;;  %s433_s25 = scalar_lea.vmem %s432_s24, 256 }
  0x1a   : > { %p434_p3 = scmp.lt.s32.totalorder %s139_s5, %s432_s24  ;;  %p435_p4 = scmp.lt.s32.totalorder %s433_s25, %s426_s20 }
  0x1b   : > { %p430_p2 = pneg %p429_p1 }
  0x1c   : > { %p436_p5 = por %p435_p4, %p434_p3 }
  0x1e   : > { %p437_p6 = pnand %p436_p5, %p430_p2 }
  0x20   : > { %440 = shalt.err (!%p437_p6)
}
  0x21   : > { %343 = dma.hbm_to_vmem [thread:$0]  (!%p605_p10), %s136_s8, 128, %s139_s5, %s126_s17  }
  0x22   : > { %p151_p8 = pnand %p328_p11, %p150_p12 }
  0x23   : > { %s156_s22 = sand.u32 (!%p151_p8), 1, %s483_s10  }
  0x24   : > { %154 = sbr.rel (%p151_p8) target bundleno = 334 (0x14e), region = 28  ;;  %s329_s26 = sshll.u32 (!%p151_p8), %s156_s22, 3 }
  0x25   : > { %s157_s27 = scalar_lea.sflag (!%p151_p8), [#allocation3], %s156_s22  ;;  %s160_s28 = scalar_lea.vmem (!%p151_p8), [#allocation2], %s329_s26 }
  0x29   : > { %474 = dma.done.wait (%p585_p7), %s157_s27, 128  }
  0x2a   : > { %476 = vsyncadd (%p585_p7), %s157_s27, 4294967168  ;;  %p184_p9 = scmp.lt.s32.totalorder %s495_s13, 2  ;;  %p332_p10 = scmp.ne.s32.totalorder %s491_s12, 0 }
  0x2c   : > { %s185_s30 = scalar_select %p184_p9, %s495_s13, 2 }
  0x2d   : > { %195 = sbr.rel (%p332_p10) target bundleno = 52 (0x34), region = 36 }
  0x2e   : > { %s330_s3 = sshll.u32 %s185_s30, 3 }
  0x2f   : > { %s187_s6 = scalar_lea.vmem %s668_s1, %s330_s3  ;;  %s632_s9 = scalar_lea.vmem %s669_s2, %s330_s3 }
  0x32   : > { %vm196_vm0 = vcmask 7168   ;;  %v510_v0 = vmov 0.0  }
  0x33   : > { %197 = vst.msk [vmem:[%s632_s9] sm:$0xff] %vm196_vm0, %v510_v0 }
  0x34 PF: > { %v199_v1 = vld [vmem:[%s187_s6] sm:$0xff]  ;;  %v511_v2 = vmov 0   ;;  %v201_v3 = vlaneseq  ;;  %s333_s23 = sshll.u32 %s491_s12, 7  ;;  %v512_v9 = vmov 0.000390625   ;;  %vm216_vm2 = vcmask 7168  }
  0x35   : > { %412 = vset.pattern.permute.xlu0 %v511_v2  ;;  %v203_v5 = vstv %s333_s23  ;;  %v198_v8 = vld [vmem:[%s160_s28] sm:$0xff]  ;;  %p334_p7 = scmp.ne.s32.totalorder %s491_s12, 1 }
  0x36   : > { %206 = vperm.xlu0 %412, %v199_v1   ;;  %v202_v4 = vand.u32 127, %v201_v3  ;;  %s335_s17 = sshll.u32 (!%p334_p7), %s495_s13, 3 }
  0x38   : > { %v204_v6 = vadd.s32 %v203_v5, %v202_v4 }
  0x3a   : > { %v210_v12 = vld [vmem:[%s632_s9] sm:$0xff] }
  0xb1   : > { %v207_v7 = vpop.permute.xlu0 %206 }
  0xb2   : > { %vm208_vm1 = vcmp.eq.s32.totalorder %v204_v6, %v207_v7 }
  0xb3   : > { %v209_v10 = vsel %vm208_vm1, 0.9003906, %v512_v9 }
  0xb4   : > { %v211_v11 = vmul.f32 %v209_v10, %v198_v8 }
  0xb6   : > { %212 = vadd.xlane.f32.xlu0 %v211_v11 }
 0x13f   : > { %v213_v13 = vpop.xlane.xlu0 %212 }
 0x140   : > { %v214_v14 = vsub.f32 0.0, %v213_v13  ;;  %221 = sbr.rel (%p334_p7) target bundleno = 334 (0x14e), region = 40 }
 0x142   : > { %v215_v15 = vadd.f32 %v214_v14, %v210_v12 }
 0x144   : > { %217 = vst.msk [vmem:[%s632_s9] sm:$0xff] %vm216_vm2, %v215_v15 }
 0x145   : > { %v224_v16 = vshrl.u32 %v201_v3, 7  ;;  %v225_v17 = vstv %s335_s17 }
 0x147   : > { %v226_v18 = vadd.s32 %v225_v17, %v224_v16 }
 0x149   : > { %vm227_vm3 = vcmp.lt.s32.totalorder %v226_v18, 20 }
 0x14b   : > { %v228_v19 = vld [vmem:[%s632_s9] sm:$0xff] }
 0x14c   : > { %v229_v20 = vsel %vm227_vm3, %v228_v19, 0.0 }
 0x14d   : > { %230 = vst.msk [vmem:[%s632_s9] sm:$0xff] %vm216_vm2, %v229_v20 }
 0x14e PF: > { %s15_s16 = sadd.s32 1, %s507_s16   ;;  %s673_s9 = smov %s483_s10 }
 0x14f   : > { %p12_p11 = scmp.ge.s32.totalorder %s15_s16, 8   ;;  %s674_s10 = smov %s487_s11 }
 0x150   : > { %s675_s11 = smov %s595_s29  ;;  %s676_s12 = smov %s499_s14 }
 0x151   : > { %s677_s13 = smov %s503_s15  ;;  %s678_s14 = smov %s681_s18 }
 0x152   : > { %s679_s15 = smov %s685_s19  ;;  %14 = sbr.rel (!%p12_p11) target bundleno = 5 (0x5), region = 79 }
 0x157   :  { %250 = vsyncpa [#allocation3], 1 }
 0x158   :  { %252 = vsyncpa [#allocation3 + $0x1], 1 }

</bundles_post_ra>
